<compile_context>
chip_gen: v5e
topology: v5e:2x2
jax: 0.10.0
libtpu: 0.0.40
codegen_flags: <defaults>
</compile_context>

<pallas_src>
import functools
import math

import jax
import jax.numpy as jnp
import numpy as np
from jax import lax
from jax.experimental import pallas as pl
from jax.experimental.pallas import tpu as pltpu


_INV_SQRT2 = 1.0 / math.sqrt(2.0)
_BUFFERED = getattr(pl, "Buffered", None)


# ------------------------------ small helpers --------------------------------

def _erf(x):
    # Abramowitz & Stegun 7.1.26 rational approximation, |err| < 1.5e-7.
    # Gives exact-erf GELU semantics without relying on an erf lowering rule.
    p = 0.3275911
    a1, a2, a3, a4, a5 = (0.254829592, -0.284496736, 1.421413741,
                          -1.453152027, 1.061405429)
    ax = jnp.abs(x)
    t = 1.0 / (1.0 + p * ax)
    poly = ((((a5 * t + a4) * t + a3) * t + a2) * t + a1) * t
    y = 1.0 - poly * jnp.exp(-ax * ax)          # exp on the EUP
    return jnp.where(x >= 0.0, y, -y)


def _gelu(x):
    # x * 0.5 * (1 + erf(x / sqrt(2))) -- matches the PyTorch module's gelu.
    return 0.5 * x * (1.0 + _erf(x * _INV_SQRT2))


def _layernorm(x, w, b, eps):
    # TF-style LayerNorm (epsilon inside the square root).
    u = jnp.mean(x, axis=-1, keepdims=True)
    xc = x - u
    s = jnp.mean(xc * xc, axis=-1, keepdims=True)
    return xc * lax.rsqrt(s + eps) * w + b


def _softmax(x):
    m = jnp.max(x, axis=-1, keepdims=True)
    e = jnp.exp(x - m)
    return e * pl.reciprocal(jnp.sum(e, axis=-1, keepdims=True), approx=True)


# --------------------------------- kernels ------------------------------------

def kv_projection_kernel(num_heads, x_ref, wk_ref, bk_ref, wv_ref, bv_ref,
                         k_ref, v_ref):
    """Head-major K/V projection.  k_ref/v_ref views are (NH, ts, hd) bf16."""
    f32, bf16 = jnp.float32, jnp.bfloat16
    x = x_ref[...].astype(bf16)                       # (ts, H)

    def head_body(h, carry):
        k_ref[h] = (jnp.dot(x, wk_ref[h], preferred_element_type=f32)
                    + bk_ref[h]).astype(bf16)
        v_ref[h] = (jnp.dot(x, wv_ref[h], preferred_element_type=f32)
                    + bv_ref[h]).astype(bf16)
        return carry

    lax.fori_loop(0, num_heads, head_body, 0, unroll=True)


def encoder_layer_kernel(num_heads, eps,
                         x_ref, k_ref, v_ref, mask_ref,
                         wq_ref, bq_ref, wo_ref, bo_ref,
                         ln1w_ref, ln1b_ref,
                         wi_ref, bi_ref, w2_ref, b2_ref,
                         ln2w_ref, ln2b_ref,
                         out_ref, acc_ref):
    f32, bf16 = jnp.float32, jnp.bfloat16
    x = x_ref[...]                                    # (tq, H) f32 residual path
    x_b = x.astype(bf16)
    mask_row = mask_ref[...].astype(f32)              # (1, S): sublane broadcast

    acc_ref[...] = jnp.zeros_like(acc_ref)

    dn = (((1,), (1,)), ((), ()))                     # q . k^T (contract head dims)

    def head_body(h, carry):
        # Q projection for this head (1/sqrt(hd) already folded into wq/bq).
        q_h = (jnp.dot(x_b, wq_ref[h], preferred_element_type=f32)
               + bq_ref[h]).astype(bf16)              # (tq, hd)
        scores = lax.dot_general(q_h, k_ref[h], dn,
                                 preferred_element_type=f32)      # (tq, S)
        probs = _softmax(scores + mask_row)           # attention dropout = id
        ctx_h = jnp.dot(probs.astype(bf16), v_ref[h],
                        preferred_element_type=f32)   # (tq, hd)
        # Fold the attention output dense per head: lane-dense (tq, H) MXU
        # output accumulated in f32 (no ctx scratch / masked partial stores).
        acc_ref[...] += jnp.dot(ctx_h.astype(bf16), wo_ref[h],
                                preferred_element_type=f32)
        return carry

    # TODO(synk): pack multiple heads per MXU contraction (>=256-wide on
    # v6e/v7x) via a head-concatenated probs @ block-diagonal V layout.
    lax.fori_loop(0, num_heads, head_body, 0, unroll=True)

    # ---- attention output bias + Residual_Norm (dropout = identity) ----------
    attn = acc_ref[...] + bo_ref[...]
    attn_out = _layernorm(attn + x, ln1w_ref[...], ln1b_ref[...], eps)

    # ---- intermediate dense + exact-erf GELU ----------------------------------
    inter = _gelu(jnp.dot(attn_out.astype(bf16), wi_ref[...],
                          preferred_element_type=f32) + bi_ref[...])

    # ---- Output_Residual_Norm (dropout = identity) -----------------------------
    out = jnp.dot(inter.astype(bf16), w2_ref[...],
                  preferred_element_type=f32) + b2_ref[...]
    out = _layernorm(out + attn_out, ln2w_ref[...], ln2b_ref[...], eps)
    out_ref[...] = out.astype(out_ref.dtype)


# ------------------------------ VMEM budgeting --------------------------------

def _vmem_cap_bytes():
    """Per-generation scoped-VMEM cap (~48 MiB on 64-MiB v7x, 56 MiB on v5e/v6e)."""
    cap = 56 * 1024 * 1024
    try:
        info = pltpu.get_tpu_info()
        phys = getattr(info, "vmem_capacity_bytes", None)
        if phys:
            cap = min(cap, max(24 * 1024 * 1024, int(phys) - 16 * 1024 * 1024))
    except Exception:
        pass
    return cap


def _clamp_vmem(estimate, cap):
    return int(min(max(estimate, 32 * 1024 * 1024), cap))


def _kv_vmem_bytes(S, H, NH, hd, ts, single_buffer):
    bf, f32 = 2, 4
    wmul = 1 if single_buffer else 2
    hd_p = ((hd + 127) // 128) * 128                  # lane-padded head dim
    weights = (2 * NH * H * hd_p * bf + 2 * NH * hd_p * f32) * wmul
    x_in = 2 * ts * H * f32
    outs = 2 * 2 * NH * ts * hd_p * bf
    work = (ts * H + 4 * ts * hd_p) * f32
    return int(1.5 * (weights + x_in + outs + work))


def _attn_vmem_bytes(S, H, I, NH, hd, tq, single_buffer):
    bf, f32 = 2, 4
    wmul = 1 if single_buffer else 2
    hd_p = ((hd + 127) // 128) * 128
    weights = ((2 * NH * H * hd_p + 2 * H * I) * bf
               + (NH * hd_p + 6 * H + I) * f32) * wmul
    kv_blocks = 2 * 2 * NH * S * hd_p * bf            # K,V (double-buffered)
    xio = 2 * (2 * tq * H + 8 * S) * f32              # x tile, out tile, mask
    scratch = tq * H * f32
    work = (2 * tq * S + tq * I + 6 * tq * H + 4 * tq * hd_p) * f32
    return int(1.5 * (weights + kv_blocks + xio + scratch + work))


# --------------------------------- wrapper -------------------------------------

def _weight_spec(shape, single_buffer):
    index_map = lambda *_: (0,) * len(shape)
    if single_buffer and _BUFFERED is not None:
        # Grid-invariant weights: a single resident VMEM buffer is enough.
        return pl.BlockSpec(shape, index_map, pipeline_mode=_BUFFERED(1))
    return pl.BlockSpec(shape, index_map)


def transformer_encoder_layer(x, attn_mask, params, *, num_heads, eps,
                              q_tile=None, kv_tile=None):
    """Forward pass of TransformerEnoderLayer (dropout layers are identity)."""
    B, S, H = x.shape
    I = params["wi"].shape[1]
    assert H % num_heads == 0
    hd = H // num_heads
    scale = 1.0 / math.sqrt(hd)

    if q_tile is None:
        q_tile = min(S, 512)          # large M tiles keep the MXU fed (v5e/v6e)
    if kv_tile is None:
        kv_tile = min(S, 512)
    assert S % q_tile == 0 and S % kv_tile == 0
    nq, nkv = S // q_tile, S // kv_tile

    f32, bf16 = jnp.float32, jnp.bfloat16

    def head_major_w(w):              # (H, H) -> (NH, H, hd)
        return jnp.transpose(w.reshape(H, num_heads, hd), (1, 0, 2))

    def head_major_b(b):              # (1, H) -> (NH, 1, hd)
        return b.reshape(num_heads, 1, hd)

    # 1/sqrt(hd) folded into the query projection parameters (one-time transform).
    wq3 = head_major_w(params["wq"] * scale).astype(bf16)
    bq3 = head_major_b(params["bq"] * scale).astype(f32)
    wk3 = head_major_w(params["wk"]).astype(bf16)
    bk3 = head_major_b(params["bk"]).astype(f32)
    wv3 = head_major_w(params["wv"]).astype(bf16)
    bv3 = head_major_b(params["bv"]).astype(f32)
    wo3 = params["wo"].reshape(num_heads, hd, H).astype(bf16)
    wi_b = params["wi"].astype(bf16)
    w2_b = params["w2"].astype(bf16)

    cap = _vmem_cap_bytes()

    def build(single_buffer):
        ws = functools.partial(_weight_spec, single_buffer=single_buffer)

        kv_call = pl.pallas_call(
            functools.partial(kv_projection_kernel, num_heads),
            out_shape=(jax.ShapeDtypeStruct((B, num_heads, S, hd), bf16),
                       jax.ShapeDtypeStruct((B, num_heads, S, hd), bf16)),
            grid=(B, nkv),
            in_specs=[
                pl.BlockSpec((None, kv_tile, H), lambda b, s: (b, s, 0)),
                ws((num_heads, H, hd)), ws((num_heads, 1, hd)),   # wk, bk
                ws((num_heads, H, hd)), ws((num_heads, 1, hd)),   # wv, bv
            ],
            out_specs=(
                pl.BlockSpec((None, num_heads, kv_tile, hd),
                             lambda b, s: (b, 0, s, 0)),
                pl.BlockSpec((None, num_heads, kv_tile, hd),
                             lambda b, s: (b, 0, s, 0)),
            ),
            compiler_params=pltpu.CompilerParams(
                dimension_semantics=("parallel", "parallel"),
                vmem_limit_bytes=_clamp_vmem(
                    _kv_vmem_bytes(S, H, num_heads, hd, kv_tile, single_buffer),
                    cap)),
        )

        # TODO(synk): for S >~ 2k on v7x, stream K/V in chunks via an extra
        # grid axis (flash-style online softmax) instead of keeping the full
        # (NH, S, hd) blocks resident in VMEM.
        attn_call = pl.pallas_call(
            functools.partial(encoder_layer_kernel, num_heads, eps),
            out_shape=jax.ShapeDtypeStruct((B, S, H), x.dtype),
            grid=(B, nq),
            in_specs=[
                pl.BlockSpec((None, q_tile, H), lambda b, q: (b, q, 0)),        # x
                pl.BlockSpec((None, num_heads, S, hd), lambda b, q: (b, 0, 0, 0)),  # K
                pl.BlockSpec((None, num_heads, S, hd), lambda b, q: (b, 0, 0, 0)),  # V
                pl.BlockSpec((None, 1, S), lambda b, q: (b, 0, 0)),              # mask
                ws((num_heads, H, hd)), ws((num_heads, 1, hd)),                  # wq, bq
                ws((num_heads, hd, H)), ws((1, H)),                              # wo, bo
                ws((1, H)), ws((1, H)),                                          # ln1 w, b
                ws((H, I)), ws((1, I)),                                          # wi, bi
                ws((I, H)), ws((1, H)),                                          # w2, b2
                ws((1, H)), ws((1, H)),                                          # ln2 w, b
            ],
            out_specs=pl.BlockSpec((None, q_tile, H), lambda b, q: (b, q, 0)),
            scratch_shapes=[pltpu.VMEM((q_tile, H), jnp.float32)],
            compiler_params=pltpu.CompilerParams(
                # No cross-step carry anymore: both axes are safe to shard
                # across TensorCores (v7x dual-TC even at per-chip batch == 1).
                dimension_semantics=("parallel", "parallel"),
                vmem_limit_bytes=_clamp_vmem(
                    _attn_vmem_bytes(S, H, I, num_heads, hd, q_tile,
                                     single_buffer), cap)),
        )

        def run(xa, ma, a_wq, a_bq, a_wk, a_bk, a_wv, a_bv, a_wo, a_bo,
                a_l1w, a_l1b, a_wi, a_bi, a_w2, a_b2, a_l2w, a_l2b):
            k, v = kv_call(xa, a_wk, a_bk, a_wv, a_bv)
            return attn_call(xa, k, v, ma, a_wq, a_bq, a_wo, a_bo,
                             a_l1w, a_l1b, a_wi, a_bi, a_w2, a_b2, a_l2w, a_l2b)

        return run

    args = (x, attn_mask, wq3, bq3, wk3, bk3, wv3, bv3, wo3,
            params["bo"], params["ln1w"], params["ln1b"],
            wi_b, params["bi"], w2_b, params["b2"],
            params["ln2w"], params["ln2b"])

    run = None
    if _BUFFERED is not None:
        try:
            cand = build(True)
            # Probe covers BUILD + LOWERING only (no execution), so genuine
            # runtime/compile-to-binary failures are never silently retried.
            jax.jit(cand).lower(*args)
            run = cand
        except Exception:
            run = None                 # pipeline_mode=Buffered(1) unsupported here
    if run is None:
        run = build(False)
    return run(*args)


# ----------------------------- pure-JAX reference -----------------------------

def reference(x, mask, p, num_heads, eps):
    B, S, H = x.shape
    hd = H // num_heads

    def split(t):
        return t.reshape(B, S, num_heads, hd).transpose(0, 2, 1, 3)

    q = split(x @ p["wq"] + p["bq"])
    k = split(x @ p["wk"] + p["bk"])
    v = split(x @ p["wv"] + p["bv"])
    scores = jnp.einsum("bhqd,bhkd->bhqk", q, k) / math.sqrt(hd)
    scores = scores + mask[:, :, None, :]            # (B,1,1,S) broadcast
    probs = jax.nn.softmax(scores, axis=-1)
    ctx = jnp.einsum("bhqk,bhkd->bhqd", probs, v).transpose(0, 2, 1, 3)
    ctx = ctx.reshape(B, S, H)

    def ln(t, w, b):
        u = t.mean(-1, keepdims=True)
        s = ((t - u) ** 2).mean(-1, keepdims=True)
        return w * ((t - u) / jnp.sqrt(s + eps)) + b

    attn_out = ln(ctx @ p["wo"] + p["bo"] + x, p["ln1w"], p["ln1b"])
    inter = jax.nn.gelu(attn_out @ p["wi"] + p["bi"], approximate=False)
    out = inter @ p["w2"] + p["b2"]
    return ln(out + attn_out, p["ln2w"], p["ln2b"])


# ------------------------------------ main -------------------------------------

if __name__ == "__main__":
    B, S, H, NH, I = 2, 16, 32, 4, 64
    Q_TILE = 8            # exercises the multi-query-tile path
    EPS = 1e-12

    key = jax.random.PRNGKey(0)
    keys = jax.random.split(key, 20)

    x = jax.random.normal(keys[0], (B, S, H), dtype=jnp.float32)
    # additive mask: 0 for kept positions, -10000 for masked positions
    mask_bits = jax.random.bernoulli(keys[1], 0.8, (B, 1, S))
    attn_mask = jnp.where(mask_bits, 0.0, -10000.0).astype(jnp.float32)

    def w(k, shape, s=0.02):
        return (s * jax.random.normal(k, shape)).astype(jnp.float32)

    params = {
        "wq": w(keys[2], (H, H)), "bq": w(keys[6], (1, H)),
        "wk": w(keys[3], (H, H)), "bk": w(keys[7], (1, H)),
        "wv": w(keys[4], (H, H)), "bv": w(keys[8], (1, H)),
        "wo": w(keys[5], (H, H)), "bo": w(keys[9], (1, H)),
        "ln1w": 1.0 + w(keys[14], (1, H), 0.1), "ln1b": w(keys[15], (1, H), 0.05),
        "wi": w(keys[10], (H, I)), "bi": w(keys[11], (1, I)),
        "w2": w(keys[12], (I, H)), "b2": w(keys[13], (1, H)),
        "ln2w": 1.0 + w(keys[16], (1, H), 0.1), "ln2b": w(keys[17], (1, H), 0.05),
    }

    out = transformer_encoder_layer(x, attn_mask, params,
                                    num_heads=NH, eps=EPS, q_tile=Q_TILE)
    out = jax.block_until_ready(out)

    ref = reference(x, attn_mask, params, NH, EPS)
    np.testing.assert_allclose(np.asarray(out), np.asarray(ref),
                               rtol=2e-2, atol=2e-2)

    print("KERNEL_OK")
</pallas_src>

<mosaic_0001>
module attributes {stable_mosaic.version = 11 : i64} {
  func.func @kv_projection_kernel(%arg0: i32, %arg1: i32, %arg2: memref<1x16x32xf32, #tpu.memory_space<vmem>>, %arg3: memref<4x32x8xbf16, #tpu.memory_space<vmem>>, %arg4: memref<4x1x8xf32, #tpu.memory_space<vmem>>, %arg5: memref<4x32x8xbf16, #tpu.memory_space<vmem>>, %arg6: memref<4x1x8xf32, #tpu.memory_space<vmem>>, %arg7: memref<1x4x16x8xbf16, #tpu.memory_space<vmem>>, %arg8: memref<1x4x16x8xbf16, #tpu.memory_space<vmem>>) attributes {dimension_semantics = [#tpu.dimension_semantics<parallel>, #tpu.dimension_semantics<parallel>], iteration_bounds = array<i64: 2, 1>, scalar_prefetch = 0 : i64, scratch_operands = 0 : i64, tpu.core_type = #tpu.core_type<tc>, window_params = [{transform_indices = @transform_0, window_bounds = array<i64: 1, 16, 32>}, {pipeline_mode = #tpu.pipeline_mode<synchronous>, transform_indices = @transform_1, window_bounds = array<i64: 4, 32, 8>}, {pipeline_mode = #tpu.pipeline_mode<synchronous>, transform_indices = @transform_2, window_bounds = array<i64: 4, 1, 8>}, {pipeline_mode = #tpu.pipeline_mode<synchronous>, transform_indices = @transform_3, window_bounds = array<i64: 4, 32, 8>}, {pipeline_mode = #tpu.pipeline_mode<synchronous>, transform_indices = @transform_4, window_bounds = array<i64: 4, 1, 8>}, {transform_indices = @transform_5, window_bounds = array<i64: 1, 4, 16, 8>}, {transform_indices = @transform_6, window_bounds = array<i64: 1, 4, 16, 8>}]} {
    %c0 = arith.constant 0 : index
    %c0_0 = arith.constant 0 : index
    %c0_1 = arith.constant 0 : index
    %0 = vector.load %arg2[%c0, %c0_0, %c0_1] : memref<1x16x32xf32, #tpu.memory_space<vmem>>, vector<1x16x32xf32>
    %1 = vector.shape_cast %0 : vector<1x16x32xf32> to vector<16x32xf32>
    %2 = arith.truncf %1 : vector<16x32xf32> to vector<16x32xbf16>
    %c0_i32 = arith.constant 0 : i32
    %3 = arith.index_cast %c0_i32 : i32 to index
    %c0_2 = arith.constant 0 : index
    %c0_3 = arith.constant 0 : index
    %4 = vector.load %arg3[%3, %c0_2, %c0_3] : memref<4x32x8xbf16, #tpu.memory_space<vmem>>, vector<1x32x8xbf16>
    %5 = vector.shape_cast %4 : vector<1x32x8xbf16> to vector<32x8xbf16>
    %cst = arith.constant dense<0.000000e+00> : vector<16x8xf32>
    %6 = tpu.matmul %2, %5, %cst {dimension_numbers = #tpu.dot_dimension_numbers<[1], [0], [0], [1], [0, 0, 1, 1], [], []>} : vector<16x32xbf16>, vector<32x8xbf16>, vector<16x8xf32> -> vector<16x8xf32>
    %7 = arith.index_cast %c0_i32 : i32 to index
    %c0_4 = arith.constant 0 : index
    %c0_5 = arith.constant 0 : index
    %8 = vector.load %arg4[%7, %c0_4, %c0_5] : memref<4x1x8xf32, #tpu.memory_space<vmem>>, vector<1x1x8xf32>
    %9 = vector.shape_cast %8 : vector<1x1x8xf32> to vector<1x8xf32>
    %10 = vector.broadcast %9 : vector<1x8xf32> to vector<16x8xf32>
    %11 = arith.addf %6, %10 : vector<16x8xf32>
    %12 = arith.truncf %11 : vector<16x8xf32> to vector<16x8xbf16>
    %c0_6 = arith.constant 0 : index
    %13 = arith.index_cast %c0_i32 : i32 to index
    %c0_7 = arith.constant 0 : index
    %c0_8 = arith.constant 0 : index
    %14 = vector.load %arg7[%c0_6, %13, %c0_7, %c0_8] : memref<1x4x16x8xbf16, #tpu.memory_space<vmem>>, vector<1x1x16x8xbf16>
    %15 = vector.shape_cast %14 : vector<1x1x16x8xbf16> to vector<16x8xbf16>
    %16 = vector.shape_cast %12 : vector<16x8xbf16> to vector<1x1x16x8xbf16>
    tpu.vector_store %arg7[%c0_6, %13, %c0_7, %c0_8], %16 {strides = array<i32>} : memref<1x4x16x8xbf16, #tpu.memory_space<vmem>>, vector<1x1x16x8xbf16>,
    %17 = arith.index_cast %c0_i32 : i32 to index
    %c0_9 = arith.constant 0 : index
    %c0_10 = arith.constant 0 : index
    %18 = vector.load %arg5[%17, %c0_9, %c0_10] : memref<4x32x8xbf16, #tpu.memory_space<vmem>>, vector<1x32x8xbf16>
    %19 = vector.shape_cast %18 : vector<1x32x8xbf16> to vector<32x8xbf16>
    %cst_11 = arith.constant dense<0.000000e+00> : vector<16x8xf32>
    %20 = tpu.matmul %2, %19, %cst_11 {dimension_numbers = #tpu.dot_dimension_numbers<[1], [0], [0], [1], [0, 0, 1, 1], [], []>} : vector<16x32xbf16>, vector<32x8xbf16>, vector<16x8xf32> -> vector<16x8xf32>
    %21 = arith.index_cast %c0_i32 : i32 to index
    %c0_12 = arith.constant 0 : index
    %c0_13 = arith.constant 0 : index
    %22 = vector.load %arg6[%21, %c0_12, %c0_13] : memref<4x1x8xf32, #tpu.memory_space<vmem>>, vector<1x1x8xf32>
    %23 = vector.shape_cast %22 : vector<1x1x8xf32> to vector<1x8xf32>
    %24 = vector.broadcast %23 : vector<1x8xf32> to vector<16x8xf32>
    %25 = arith.addf %20, %24 : vector<16x8xf32>
    %26 = arith.truncf %25 : vector<16x8xf32> to vector<16x8xbf16>
    %c0_14 = arith.constant 0 : index
    %27 = arith.index_cast %c0_i32 : i32 to index
    %c0_15 = arith.constant 0 : index
    %c0_16 = arith.constant 0 : index
    %28 = vector.load %arg8[%c0_14, %27, %c0_15, %c0_16] : memref<1x4x16x8xbf16, #tpu.memory_space<vmem>>, vector<1x1x16x8xbf16>
    %29 = vector.shape_cast %28 : vector<1x1x16x8xbf16> to vector<16x8xbf16>
    %30 = vector.shape_cast %26 : vector<16x8xbf16> to vector<1x1x16x8xbf16>
    tpu.vector_store %arg8[%c0_14, %27, %c0_15, %c0_16], %30 {strides = array<i32>} : memref<1x4x16x8xbf16, #tpu.memory_space<vmem>>, vector<1x1x16x8xbf16>,
    %c1_i32 = arith.constant 1 : i32
    %31 = arith.index_cast %c1_i32 : i32 to index
    %c0_17 = arith.constant 0 : index
    %c0_18 = arith.constant 0 : index
    %32 = vector.load %arg3[%31, %c0_17, %c0_18] : memref<4x32x8xbf16, #tpu.memory_space<vmem>>, vector<1x32x8xbf16>
    %33 = vector.shape_cast %32 : vector<1x32x8xbf16> to vector<32x8xbf16>
    %cst_19 = arith.constant dense<0.000000e+00> : vector<16x8xf32>
    %34 = tpu.matmul %2, %33, %cst_19 {dimension_numbers = #tpu.dot_dimension_numbers<[1], [0], [0], [1], [0, 0, 1, 1], [], []>} : vector<16x32xbf16>, vector<32x8xbf16>, vector<16x8xf32> -> vector<16x8xf32>
    %35 = arith.index_cast %c1_i32 : i32 to index
    %c0_20 = arith.constant 0 : index
    %c0_21 = arith.constant 0 : index
    %36 = vector.load %arg4[%35, %c0_20, %c0_21] : memref<4x1x8xf32, #tpu.memory_space<vmem>>, vector<1x1x8xf32>
    %37 = vector.shape_cast %36 : vector<1x1x8xf32> to vector<1x8xf32>
    %38 = vector.broadcast %37 : vector<1x8xf32> to vector<16x8xf32>
    %39 = arith.addf %34, %38 : vector<16x8xf32>
    %40 = arith.truncf %39 : vector<16x8xf32> to vector<16x8xbf16>
    %c0_22 = arith.constant 0 : index
    %41 = arith.index_cast %c1_i32 : i32 to index
    %c0_23 = arith.constant 0 : index
    %c0_24 = arith.constant 0 : index
    %42 = vector.load %arg7[%c0_22, %41, %c0_23, %c0_24] : memref<1x4x16x8xbf16, #tpu.memory_space<vmem>>, vector<1x1x16x8xbf16>
    %43 = vector.shape_cast %42 : vector<1x1x16x8xbf16> to vector<16x8xbf16>
    %44 = vector.shape_cast %40 : vector<16x8xbf16> to vector<1x1x16x8xbf16>
    tpu.vector_store %arg7[%c0_22, %41, %c0_23, %c0_24], %44 {strides = array<i32>} : memref<1x4x16x8xbf16, #tpu.memory_space<vmem>>, vector<1x1x16x8xbf16>,
    %45 = arith.index_cast %c1_i32 : i32 to index
    %c0_25 = arith.constant 0 : index
    %c0_26 = arith.constant 0 : index
    %46 = vector.load %arg5[%45, %c0_25, %c0_26] : memref<4x32x8xbf16, #tpu.memory_space<vmem>>, vector<1x32x8xbf16>
    %47 = vector.shape_cast %46 : vector<1x32x8xbf16> to vector<32x8xbf16>
    %cst_27 = arith.constant dense<0.000000e+00> : vector<16x8xf32>
    %48 = tpu.matmul %2, %47, %cst_27 {dimension_numbers = #tpu.dot_dimension_numbers<[1], [0], [0], [1], [0, 0, 1, 1], [], []>} : vector<16x32xbf16>, vector<32x8xbf16>, vector<16x8xf32> -> vector<16x8xf32>
    %49 = arith.index_cast %c1_i32 : i32 to index
    %c0_28 = arith.constant 0 : index
    %c0_29 = arith.constant 0 : index
    %50 = vector.load %arg6[%49, %c0_28, %c0_29] : memref<4x1x8xf32, #tpu.memory_space<vmem>>, vector<1x1x8xf32>
    %51 = vector.shape_cast %50 : vector<1x1x8xf32> to vector<1x8xf32>
    %52 = vector.broadcast %51 : vector<1x8xf32> to vector<16x8xf32>
    %53 = arith.addf %48, %52 : vector<16x8xf32>
    %54 = arith.truncf %53 : vector<16x8xf32> to vector<16x8xbf16>
    %c0_30 = arith.constant 0 : index
    %55 = arith.index_cast %c1_i32 : i32 to index
    %c0_31 = arith.constant 0 : index
    %c0_32 = arith.constant 0 : index
    %56 = vector.load %arg8[%c0_30, %55, %c0_31, %c0_32] : memref<1x4x16x8xbf16, #tpu.memory_space<vmem>>, vector<1x1x16x8xbf16>
    %57 = vector.shape_cast %56 : vector<1x1x16x8xbf16> to vector<16x8xbf16>
    %58 = vector.shape_cast %54 : vector<16x8xbf16> to vector<1x1x16x8xbf16>
    tpu.vector_store %arg8[%c0_30, %55, %c0_31, %c0_32], %58 {strides = array<i32>} : memref<1x4x16x8xbf16, #tpu.memory_space<vmem>>, vector<1x1x16x8xbf16>,
    %c2_i32 = arith.constant 2 : i32
    %59 = arith.index_cast %c2_i32 : i32 to index
    %c0_33 = arith.constant 0 : index
    %c0_34 = arith.constant 0 : index
    %60 = vector.load %arg3[%59, %c0_33, %c0_34] : memref<4x32x8xbf16, #tpu.memory_space<vmem>>, vector<1x32x8xbf16>
    %61 = vector.shape_cast %60 : vector<1x32x8xbf16> to vector<32x8xbf16>
    %cst_35 = arith.constant dense<0.000000e+00> : vector<16x8xf32>
    %62 = tpu.matmul %2, %61, %cst_35 {dimension_numbers = #tpu.dot_dimension_numbers<[1], [0], [0], [1], [0, 0, 1, 1], [], []>} : vector<16x32xbf16>, vector<32x8xbf16>, vector<16x8xf32> -> vector<16x8xf32>
    %63 = arith.index_cast %c2_i32 : i32 to index
    %c0_36 = arith.constant 0 : index
    %c0_37 = arith.constant 0 : index
    %64 = vector.load %arg4[%63, %c0_36, %c0_37] : memref<4x1x8xf32, #tpu.memory_space<vmem>>, vector<1x1x8xf32>
    %65 = vector.shape_cast %64 : vector<1x1x8xf32> to vector<1x8xf32>
    %66 = vector.broadcast %65 : vector<1x8xf32> to vector<16x8xf32>
    %67 = arith.addf %62, %66 : vector<16x8xf32>
    %68 = arith.truncf %67 : vector<16x8xf32> to vector<16x8xbf16>
    %c0_38 = arith.constant 0 : index
    %69 = arith.index_cast %c2_i32 : i32 to index
    %c0_39 = arith.constant 0 : index
    %c0_40 = arith.constant 0 : index
    %70 = vector.load %arg7[%c0_38, %69, %c0_39, %c0_40] : memref<1x4x16x8xbf16, #tpu.memory_space<vmem>>, vector<1x1x16x8xbf16>
    %71 = vector.shape_cast %70 : vector<1x1x16x8xbf16> to vector<16x8xbf16>
    %72 = vector.shape_cast %68 : vector<16x8xbf16> to vector<1x1x16x8xbf16>
    tpu.vector_store %arg7[%c0_38, %69, %c0_39, %c0_40], %72 {strides = array<i32>} : memref<1x4x16x8xbf16, #tpu.memory_space<vmem>>, vector<1x1x16x8xbf16>,
    %73 = arith.index_cast %c2_i32 : i32 to index
    %c0_41 = arith.constant 0 : index
    %c0_42 = arith.constant 0 : index
    %74 = vector.load %arg5[%73, %c0_41, %c0_42] : memref<4x32x8xbf16, #tpu.memory_space<vmem>>, vector<1x32x8xbf16>
    %75 = vector.shape_cast %74 : vector<1x32x8xbf16> to vector<32x8xbf16>
    %cst_43 = arith.constant dense<0.000000e+00> : vector<16x8xf32>
    %76 = tpu.matmul %2, %75, %cst_43 {dimension_numbers = #tpu.dot_dimension_numbers<[1], [0], [0], [1], [0, 0, 1, 1], [], []>} : vector<16x32xbf16>, vector<32x8xbf16>, vector<16x8xf32> -> vector<16x8xf32>
    %77 = arith.index_cast %c2_i32 : i32 to index
    %c0_44 = arith.constant 0 : index
    %c0_45 = arith.constant 0 : index
    %78 = vector.load %arg6[%77, %c0_44, %c0_45] : memref<4x1x8xf32, #tpu.memory_space<vmem>>, vector<1x1x8xf32>
    %79 = vector.shape_cast %78 : vector<1x1x8xf32> to vector<1x8xf32>
    %80 = vector.broadcast %79 : vector<1x8xf32> to vector<16x8xf32>
    %81 = arith.addf %76, %80 : vector<16x8xf32>
    %82 = arith.truncf %81 : vector<16x8xf32> to vector<16x8xbf16>
    %c0_46 = arith.constant 0 : index
    %83 = arith.index_cast %c2_i32 : i32 to index
    %c0_47 = arith.constant 0 : index
    %c0_48 = arith.constant 0 : index
    %84 = vector.load %arg8[%c0_46, %83, %c0_47, %c0_48] : memref<1x4x16x8xbf16, #tpu.memory_space<vmem>>, vector<1x1x16x8xbf16>
    %85 = vector.shape_cast %84 : vector<1x1x16x8xbf16> to vector<16x8xbf16>
    %86 = vector.shape_cast %82 : vector<16x8xbf16> to vector<1x1x16x8xbf16>
    tpu.vector_store %arg8[%c0_46, %83, %c0_47, %c0_48], %86 {strides = array<i32>} : memref<1x4x16x8xbf16, #tpu.memory_space<vmem>>, vector<1x1x16x8xbf16>,
    %c3_i32 = arith.constant 3 : i32
    %87 = arith.index_cast %c3_i32 : i32 to index
    %c0_49 = arith.constant 0 : index
    %c0_50 = arith.constant 0 : index
    %88 = vector.load %arg3[%87, %c0_49, %c0_50] : memref<4x32x8xbf16, #tpu.memory_space<vmem>>, vector<1x32x8xbf16>
    %89 = vector.shape_cast %88 : vector<1x32x8xbf16> to vector<32x8xbf16>
    %cst_51 = arith.constant dense<0.000000e+00> : vector<16x8xf32>
    %90 = tpu.matmul %2, %89, %cst_51 {dimension_numbers = #tpu.dot_dimension_numbers<[1], [0], [0], [1], [0, 0, 1, 1], [], []>} : vector<16x32xbf16>, vector<32x8xbf16>, vector<16x8xf32> -> vector<16x8xf32>
    %91 = arith.index_cast %c3_i32 : i32 to index
    %c0_52 = arith.constant 0 : index
    %c0_53 = arith.constant 0 : index
    %92 = vector.load %arg4[%91, %c0_52, %c0_53] : memref<4x1x8xf32, #tpu.memory_space<vmem>>, vector<1x1x8xf32>
    %93 = vector.shape_cast %92 : vector<1x1x8xf32> to vector<1x8xf32>
    %94 = vector.broadcast %93 : vector<1x8xf32> to vector<16x8xf32>
    %95 = arith.addf %90, %94 : vector<16x8xf32>
    %96 = arith.truncf %95 : vector<16x8xf32> to vector<16x8xbf16>
    %c0_54 = arith.constant 0 : index
    %97 = arith.index_cast %c3_i32 : i32 to index
    %c0_55 = arith.constant 0 : index
    %c0_56 = arith.constant 0 : index
    %98 = vector.load %arg7[%c0_54, %97, %c0_55, %c0_56] : memref<1x4x16x8xbf16, #tpu.memory_space<vmem>>, vector<1x1x16x8xbf16>
    %99 = vector.shape_cast %98 : vector<1x1x16x8xbf16> to vector<16x8xbf16>
    %100 = vector.shape_cast %96 : vector<16x8xbf16> to vector<1x1x16x8xbf16>
    tpu.vector_store %arg7[%c0_54, %97, %c0_55, %c0_56], %100 {strides = array<i32>} : memref<1x4x16x8xbf16, #tpu.memory_space<vmem>>, vector<1x1x16x8xbf16>,
    %101 = arith.index_cast %c3_i32 : i32 to index
    %c0_57 = arith.constant 0 : index
    %c0_58 = arith.constant 0 : index
    %102 = vector.load %arg5[%101, %c0_57, %c0_58] : memref<4x32x8xbf16, #tpu.memory_space<vmem>>, vector<1x32x8xbf16>
    %103 = vector.shape_cast %102 : vector<1x32x8xbf16> to vector<32x8xbf16>
    %cst_59 = arith.constant dense<0.000000e+00> : vector<16x8xf32>
    %104 = tpu.matmul %2, %103, %cst_59 {dimension_numbers = #tpu.dot_dimension_numbers<[1], [0], [0], [1], [0, 0, 1, 1], [], []>} : vector<16x32xbf16>, vector<32x8xbf16>, vector<16x8xf32> -> vector<16x8xf32>
    %105 = arith.index_cast %c3_i32 : i32 to index
    %c0_60 = arith.constant 0 : index
    %c0_61 = arith.constant 0 : index
    %106 = vector.load %arg6[%105, %c0_60, %c0_61] : memref<4x1x8xf32, #tpu.memory_space<vmem>>, vector<1x1x8xf32>
    %107 = vector.shape_cast %106 : vector<1x1x8xf32> to vector<1x8xf32>
    %108 = vector.broadcast %107 : vector<1x8xf32> to vector<16x8xf32>
    %109 = arith.addf %104, %108 : vector<16x8xf32>
    %110 = arith.truncf %109 : vector<16x8xf32> to vector<16x8xbf16>
    %c0_62 = arith.constant 0 : index
    %111 = arith.index_cast %c3_i32 : i32 to index
    %c0_63 = arith.constant 0 : index
    %c0_64 = arith.constant 0 : index
    %112 = vector.load %arg8[%c0_62, %111, %c0_63, %c0_64] : memref<1x4x16x8xbf16, #tpu.memory_space<vmem>>, vector<1x1x16x8xbf16>
    %113 = vector.shape_cast %112 : vector<1x1x16x8xbf16> to vector<16x8xbf16>
    %114 = vector.shape_cast %110 : vector<16x8xbf16> to vector<1x1x16x8xbf16>
    tpu.vector_store %arg8[%c0_62, %111, %c0_63, %c0_64], %114 {strides = array<i32>} : memref<1x4x16x8xbf16, #tpu.memory_space<vmem>>, vector<1x1x16x8xbf16>,
    %c4_i32 = arith.constant 4 : i32
    return
  }
  func.func @transform_0(%arg0: i32, %arg1: i32) -> (i32, i32, i32) {
    %c0_i32 = arith.constant 0 : i32
    %c0_i32_0 = arith.constant 0 : i32
    return %arg0, %arg1, %c0_i32 : i32, i32, i32
  }
  func.func @transform_1(%arg0: i32, %arg1: i32) -> (i32, i32, i32) {
    %c0_i32 = arith.constant 0 : i32
    %c0_i32_0 = arith.constant 0 : i32
    %c0_i32_1 = arith.constant 0 : i32
    %c0_i32_2 = arith.constant 0 : i32
    return %c0_i32, %c0_i32_0, %c0_i32_1 : i32, i32, i32
  }
  func.func @transform_2(%arg0: i32, %arg1: i32) -> (i32, i32, i32) {
    %c0_i32 = arith.constant 0 : i32
    %c0_i32_0 = arith.constant 0 : i32
    %c0_i32_1 = arith.constant 0 : i32
    %c0_i32_2 = arith.constant 0 : i32
    return %c0_i32, %c0_i32_0, %c0_i32_1 : i32, i32, i32
  }
  func.func @transform_3(%arg0: i32, %arg1: i32) -> (i32, i32, i32) {
    %c0_i32 = arith.constant 0 : i32
    %c0_i32_0 = arith.constant 0 : i32
    %c0_i32_1 = arith.constant 0 : i32
    %c0_i32_2 = arith.constant 0 : i32
    return %c0_i32, %c0_i32_0, %c0_i32_1 : i32, i32, i32
  }
  func.func @transform_4(%arg0: i32, %arg1: i32) -> (i32, i32, i32) {
    %c0_i32 = arith.constant 0 : i32
    %c0_i32_0 = arith.constant 0 : i32
    %c0_i32_1 = arith.constant 0 : i32
    %c0_i32_2 = arith.constant 0 : i32
    return %c0_i32, %c0_i32_0, %c0_i32_1 : i32, i32, i32
  }
  func.func @transform_5(%arg0: i32, %arg1: i32) -> (i32, i32, i32, i32) {
    %c0_i32 = arith.constant 0 : i32
    %c0_i32_0 = arith.constant 0 : i32
    %c0_i32_1 = arith.constant 0 : i32
    return %arg0, %c0_i32, %arg1, %c0_i32_0 : i32, i32, i32, i32
  }
  func.func @transform_6(%arg0: i32, %arg1: i32) -> (i32, i32, i32, i32) {
    %c0_i32 = arith.constant 0 : i32
    %c0_i32_0 = arith.constant 0 : i32
    %c0_i32_1 = arith.constant 0 : i32
    return %arg0, %c0_i32, %arg1, %c0_i32_0 : i32, i32, i32, i32
  }
}

</mosaic_0001>

<bundles_post_ra>
// kernel: tpu_custom_call.1
= control target key start
LH: loop header
LB: loop body
LE: loop exit
PB: predicated region body
PF: predicated region fallthrough
CT: control target
= control target key end

     0   :  { %s1020_s21 = smov 0   ;;  %s1022_s22 = smov 0   ;;  %s1176_s0 = inlined_call_operand.vmem [shape: f32[2,16,32], index: 0, kind: input, shape index: {}]   ;;  %s1177_s1 = inlined_call_operand.vmem [shape: bf16[4,32,8], index: 1, kind: input, shape index: {}]   ;;  %s1178_s2 = inlined_call_operand.vmem [shape: f32[4,1,8], index: 2, kind: input, shape index: {}]   ;;  %s1179_s3 = inlined_call_operand.vmem [shape: bf16[4,32,8], index: 3, kind: input, shape index: {}]   ;;  %s1180_s4 = inlined_call_operand.vmem [shape: f32[4,1,8], index: 4, kind: input, shape index: {}]   ;;  %s1181_s5 = inlined_call_operand.vmem [shape: bf16[2,4,16,8], index: 5, kind: output, shape index: {0}]   ;;  %s1182_s6 = inlined_call_operand.vmem [shape: bf16[2,4,16,8], index: 6, kind: output, shape index: {1}]  }
   0x1   :  { %s1024_s23 = smov 0  }
   0x2 LB: > { %s29_s24 = sadd.s32 1, %s979_s22  ;;  %p787_p0 = scmp.ge.s32.totalorder %s983_s23, 1  ;;  %s983_s23 = sphi %s1024_s23, %s17_s23   ;;  %s979_s22 = sphi %s1022_s22, %s1184_s22   ;;  %s975_s21 = sphi %s1020_s21, %s1183_s21  }
   0x3   : > { %p31_p1 = scmp.ge.s32.totalorder %s29_s24, 2  ;;  %p238_p2 = scmp.lt.s32.totalorder %s983_s23, 3 }
   0x5   : > { %s1186_s24 = smov (%p31_p1, %s29_s24), 0  ;;  %p239_p3 = pnand %p787_p0, %p238_p2 }
   0x6   : > { %p286_p4 = scmp.lt.s32.totalorder (!%p239_p3), %s975_s21, 1 }
   0x7   : > { %242 = sbr.rel (%p239_p3) target bundleno = 184 (0xb8), region = 40 }
   0xc   : > { %v914_v0 = vld [vmem:[%s1177_s1 + $0x8] sm:$0xff]  ;;  %v918_v2 = vld [vmem:[%s1177_s1 + $0x18] sm:$0xff]  ;;  %v913_v4 = vld [vmem:[%s1177_s1] sm:$0xff]  ;;  %s1188_s21 = smov (!%p286_p4, %s975_s21), 1  ;;  %vm339_vm0 = vcmask 261120   ;;  %vm359_vm1 = vcmask 60416  }
   0xd   : > { %v916_v1 = vld [vmem:[%s1179_s3 + $0x8] sm:$0xff]  ;;  %v920_v3 = vld [vmem:[%s1179_s3 + $0x18] sm:$0xff]  ;;  %349 = vmatpush.bf16.msra.mxu0 %v914_v0  ;;  %v915_v5 = vld [vmem:[%s1179_s3] sm:$0xff]  ;;  %428 = vmatpush.bf16.msra.mxu2 %v918_v2  ;;  %s910_s17 = sshll.u32 %s1188_s21, 4  ;;  %s911_s25 = sshll.u32 %s1188_s21, 5 }
   0xe   : > { %388 = vmatpush.bf16.msra.mxu1 %v916_v1  ;;  %469 = vmatpush.bf16.msra.mxu3 %v920_v3  ;;  %v917_v6 = vld [vmem:[%s1177_s1 + $0x10] sm:$0xff]  ;;  %v926_v8 = vld [vmem:[%s1177_s1 + $0x38] sm:$0xff]  ;;  %s293_s28 = scalar_lea.vmem %s1176_s0, %s910_s17  ;;  %v922_v10 = vld [vmem:[%s1177_s1 + $0x28] sm:$0xff]  ;;  %s1115_s7 = scalar_lea.vmem %s1182_s6, %s911_s25 }
   0xf   : > { %v919_v7 = vld [vmem:[%s1179_s3 + $0x10] sm:$0xff]  ;;  %v928_v9 = vld [vmem:[%s1179_s3 + $0x38] sm:$0xff]  ;;  %v924_v11 = vld [vmem:[%s1179_s3 + $0x28] sm:$0xff] }
  0x10   : > { %v316_v12 = vld [vmem:[%s293_s28] sm:$0xff]  ;;  %v317_v13 = vld [vmem:[%s293_s28 + $0x8] sm:$0xff]  ;;  %v925_v14 = vld [vmem:[%s1177_s1 + $0x30] sm:$0xff]  ;;  %s1110_s28 = scalar_lea.vmem %s1181_s5, %s911_s25 }
  0x11   : > { %350 = vmatpush.bf16.msra.mxu0 %v913_v4  ;;  %v927_v15 = vld [vmem:[%s1179_s3 + $0x30] sm:$0xff]  ;;  %429 = vmatpush.bf16.msra.mxu2 %v917_v6  ;;  %v318_v16 = vpack.c.bf16 %v317_v13, %v316_v12  ;;  %v921_v17 = vld [vmem:[%s1177_s1 + $0x20] sm:$0xff] }
  0x12   : > { %389 = vmatpush.bf16.msra.mxu1 %v915_v5  ;;  %470 = vmatpush.bf16.msra.mxu3 %v919_v7  ;;  %v923_v18 = vld [vmem:[%s1179_s3 + $0x20] sm:$0xff] }
  0x13   : > { %v953_v19 = vld [vmem:[%s1178_s2] ss:$0 sm:$0xff]  ;;  %v955_v27 = vld [vmem:[%s1178_s2 + $0x1] ss:$0 sm:$0xff]  ;;  %v957_v41 = vld [vmem:[%s1178_s2 + $0x2] ss:$0 sm:$0xff] }
  0x14   : > { %802 = vmatmul.msk.bf16.vlgmr.msra.gmra.mxu0 %vm339_vm0, %v318_v16  ;;  %825 = vmatmul.msk.bf16.vlgmr.msra.gmra.mxu2 %vm339_vm0, %v318_v16  ;;  %v954_v20 = vld [vmem:[%s1180_s4] ss:$0 sm:$0xff]  ;;  %v956_v28 = vld [vmem:[%s1180_s4 + $0x1] ss:$0 sm:$0xff]  ;;  %v958_v42 = vld [vmem:[%s1180_s4 + $0x2] ss:$0 sm:$0xff] }
  0x15   : > { %592 = vmatpush.bf16.msrb.mxu2 %v926_v8  ;;  %811 = vmatmul.msk.bf16.vlgmr.msra.gmra.mxu1 %vm339_vm0, %v318_v16  ;;  %v959_v55 = vld [vmem:[%s1178_s2 + $0x3] ss:$0 sm:$0xff] }
  0x16   : > { %633 = vmatpush.bf16.msrb.mxu3 %v928_v9  ;;  %510 = vmatpush.bf16.msrb.mxu0 %v922_v10  ;;  %v960_v56 = vld [vmem:[%s1180_s4 + $0x3] ss:$0 sm:$0xff] }
  0x17   : > { %841 = vmatmul.msk.bf16.vlgmr.msra.gmra.mxu3 %vm339_vm0, %v318_v16  ;;  %551 = vmatpush.bf16.msrb.mxu1 %v924_v11 }
  0x19   : > { %593 = vmatpush.bf16.msrb.mxu2 %v925_v14 }
  0x1a   : > { %634 = vmatpush.bf16.msrb.mxu3 %v927_v15  ;;  %511 = vmatpush.bf16.msrb.mxu0 %v921_v17 }
  0x1b   : > { %552 = vmatpush.bf16.msrb.mxu1 %v923_v18 }
  0x24   : > { %857 = vmatmul.msk.bf16.vlgmr.msrb.gmra.mxu0 %vm339_vm0, %v318_v16  ;;  %889 = vmatmul.msk.bf16.vlgmr.msrb.gmra.mxu2 %vm339_vm0, %v318_v16 }
  0x25   : > { %873 = vmatmul.msk.bf16.vlgmr.msrb.gmra.mxu1 %vm339_vm0, %v318_v16 }
  0x27   : > { %905 = vmatmul.msk.bf16.vlgmr.msrb.gmra.mxu3 %vm339_vm0, %v318_v16 }
  0x91   : > { %v352_v21 = vpop.f32.mrf.mxu0 }
  0x92   : > { %v391_v22 = vpop.f32.mrf.mxu1  ;;  %v353_v23 = vadd.f32 %v953_v19, %v352_v21 }
  0x93   : > { %v392_v24 = vadd.f32 %v954_v20, %v391_v22 }
  0x94   : > { %v357_v25 = vpack.c.bf16 %v353_v23, %v353_v23 }
  0x95   : > { %v396_v26 = vpack.c.bf16 %v392_v24, %v392_v24 }
  0x96   : > { %360 = vst.msk [vmem:[%s1110_s28] sm:$0xf] %vm359_vm1, %v357_v25 }
  0x97   : > { %398 = vst.msk [vmem:[%s1115_s7] sm:$0xf] %vm359_vm1, %v396_v26  ;;  %v431_v29 = vpop.f32.mrf.mxu2 }
  0x98   : > { %v432_v31 = vadd.f32 %v955_v27, %v431_v29 }
  0x99   : > { %v354_v33 = vpop.f32.mrf.mxu0 }
  0x9a   : > { %v472_v30 = vpop.f32.mrf.mxu3  ;;  %v393_v34 = vpop.f32.mrf.mxu1  ;;  %v355_v35 = vadd.f32 %v953_v19, %v354_v33  ;;  %v436_v37 = vpack.c.bf16 %v432_v31, %v432_v31 }
  0x9b   : > { %v473_v32 = vadd.f32 %v956_v28, %v472_v30  ;;  %v394_v36 = vadd.f32 %v954_v20, %v393_v34 }
  0x9c   : > { %v358_v39 = vpack.c.bf16 %v355_v35, %v355_v35  ;;  %826 = vst.msk [vmem:[%s1110_s28 + $0x8] sm:$0xf] %vm359_vm1, %v436_v37 }
  0x9d   : > { %v477_v38 = vpack.c.bf16 %v473_v32, %v473_v32  ;;  %v397_v40 = vpack.c.bf16 %v394_v36, %v394_v36 }
  0x9e   : > { %361 = vst.msk [vmem:[%s1110_s28 + $0x4] sm:$0xf] %vm359_vm1, %v358_v39 }
  0x9f   : > { %842 = vst.msk [vmem:[%s1115_s7 + $0x8] sm:$0xf] %vm359_vm1, %v477_v38  ;;  %v433_v43 = vpop.f32.mrf.mxu2 }
  0xa0   : > { %399 = vst.msk [vmem:[%s1115_s7 + $0x4] sm:$0xf] %vm359_vm1, %v397_v40  ;;  %v434_v45 = vadd.f32 %v955_v27, %v433_v43 }
  0xa1   : > { %v513_v47 = vpop.f32.mrf.mxu0 }
  0xa2   : > { %v474_v44 = vpop.f32.mrf.mxu3  ;;  %v554_v48 = vpop.f32.mrf.mxu1  ;;  %v514_v49 = vadd.f32 %v957_v41, %v513_v47  ;;  %v437_v51 = vpack.c.bf16 %v434_v45, %v434_v45 }
  0xa3   : > { %v475_v46 = vadd.f32 %v956_v28, %v474_v44  ;;  %v555_v50 = vadd.f32 %v958_v42, %v554_v48 }
  0xa4   : > { %v518_v53 = vpack.c.bf16 %v514_v49, %v514_v49  ;;  %827 = vst.msk [vmem:[%s1110_s28 + $0xc] sm:$0xf] %vm359_vm1, %v437_v51 }
  0xa5   : > { %v478_v52 = vpack.c.bf16 %v475_v46, %v475_v46  ;;  %v559_v54 = vpack.c.bf16 %v555_v50, %v555_v50 }
  0xa6   : > { %858 = vst.msk [vmem:[%s1110_s28 + $0x10] sm:$0xf] %vm359_vm1, %v518_v53 }
  0xa7   : > { %843 = vst.msk [vmem:[%s1115_s7 + $0xc] sm:$0xf] %vm359_vm1, %v478_v52  ;;  %v595_v57 = vpop.f32.mrf.mxu2 }
  0xa8   : > { %874 = vst.msk [vmem:[%s1115_s7 + $0x10] sm:$0xf] %vm359_vm1, %v559_v54  ;;  %v596_v59 = vadd.f32 %v959_v55, %v595_v57 }
  0xa9   : > { %v515_v61 = vpop.f32.mrf.mxu0 }
  0xaa   : > { %v636_v58 = vpop.f32.mrf.mxu3  ;;  %v556_v62 = vpop.f32.mrf.mxu1  ;;  %v516_v63 = vadd.f32 %v957_v41, %v515_v61  ;;  %v600_v1 = vpack.c.bf16 %v596_v59, %v596_v59 }
  0xab   : > { %v637_v60 = vadd.f32 %v960_v56, %v636_v58  ;;  %v557_v0 = vadd.f32 %v958_v42, %v556_v62 }
  0xac   : > { %v519_v3 = vpack.c.bf16 %v516_v63, %v516_v63  ;;  %890 = vst.msk [vmem:[%s1110_s28 + $0x18] sm:$0xf] %vm359_vm1, %v600_v1 }
  0xad   : > { %v641_v2 = vpack.c.bf16 %v637_v60, %v637_v60  ;;  %v560_v4 = vpack.c.bf16 %v557_v0, %v557_v0 }
  0xae   : > { %859 = vst.msk [vmem:[%s1110_s28 + $0x14] sm:$0xf] %vm359_vm1, %v519_v3 }
  0xaf   : > { %906 = vst.msk [vmem:[%s1115_s7 + $0x18] sm:$0xf] %vm359_vm1, %v641_v2  ;;  %v597_v5 = vpop.f32.mrf.mxu2 }
  0xb0   : > { %875 = vst.msk [vmem:[%s1115_s7 + $0x14] sm:$0xf] %vm359_vm1, %v560_v4  ;;  %v598_v7 = vadd.f32 %v959_v55, %v597_v5 }
  0xb2   : > { %v638_v6 = vpop.f32.mrf.mxu3  ;;  %v601_v9 = vpack.c.bf16 %v598_v7, %v598_v7 }
  0xb3   : > { %v639_v8 = vadd.f32 %v960_v56, %v638_v6 }
  0xb4   : > { %891 = vst.msk [vmem:[%s1110_s28 + $0x1c] sm:$0xf] %vm359_vm1, %v601_v9 }
  0xb5   : > { %v642_v10 = vpack.c.bf16 %v639_v8, %v639_v8 }
  0xb7   : > { %907 = vst.msk [vmem:[%s1115_s7 + $0x1c] sm:$0xf] %vm359_vm1, %v642_v10 }
  0xb8 PF: > { %s17_s23 = sadd.s32 1, %s983_s23   ;;  %s1183_s21 = smov %s979_s22 }
  0xb9   : > { %p14_p5 = scmp.ge.s32.totalorder %s17_s23, 4   ;;  %s1184_s22 = smov %s1186_s24 }
  0xbb   :  { %16 = sbr.rel (!%p14_p5) target bundleno = 2 (0x2), region = 100 }

</bundles_post_ra>
